<compile_context>
chip_gen: v5e
topology: v5e:2x2
jax: 0.10.0
libtpu: 0.0.40
codegen_flags: <defaults>
</compile_context>

<pallas_src>
import functools

import jax
import jax.numpy as jnp
from jax import lax
from jax.experimental import pallas as pl
from jax.experimental.pallas import tpu as pltpu

_LANES = 128
_SUBLANE = {4: 8, 2: 16, 1: 32}            # f32 / bf16,f16 / int8,fp8
# Single-pass path: whole spatial extent in one block, used when at least one
# sublane group of rows fits a ~2 MiB block (=> S <= 65536 for all dtypes).
_SINGLE_PASS_BYTES = 2 * 1024 * 1024
# Tiled path: 64 rows -> each (rows,128) f32 accumulator = 8 vregs.
_ROW_BLOCK_TILED = 64
_COL_BLOCK_MAX = 65536                      # keeps n_col >= 2 in the tiled path


def _tiled_block_bytes():
    """~2 MiB HBM tiles on v5e/v6e, ~8 MiB on v7x (3.2 TB/s HBM)."""
    try:
        kind = jax.devices()[0].device_kind.lower()
    except Exception:
        kind = ""
    return (8 << 20) if "v7" in kind else (2 << 20)


# ---------------------------------------------------------------------------
# Kernels
# ---------------------------------------------------------------------------

def _pool_single_kernel(x_ref, sum_ref, max_ref):
    """Whole spatial extent in one block: one pass, no scratch, no masking."""
    rows, s_cols = x_ref.shape
    if s_cols % _LANES == 0 and s_cols > _LANES and rows <= _ROW_BLOCK_TILED:
        # Chunked convert-and-reduce: avoids materializing a full f32 copy of
        # sub-32-bit inputs and keeps the accumulators register-resident.
        n_chunks = s_cols // _LANES

        def body(j, carry):
            ps, pm = carry
            off = pl.multiple_of(j * _LANES, _LANES)
            xj = x_ref[:, pl.ds(off, _LANES)].astype(jnp.float32)
            return ps + xj, jnp.maximum(pm, xj)

        ps, pm = lax.fori_loop(
            0, n_chunks, body,
            (jnp.zeros((rows, _LANES), jnp.float32),
             jnp.full((rows, _LANES), -jnp.inf, jnp.float32)),
            unroll=min(8, n_chunks))
        sum_ref[...] = jnp.sum(ps, axis=-1, keepdims=True)
        max_ref[...] = jnp.max(pm, axis=-1, keepdims=True)
    else:
        x = x_ref[...].astype(jnp.float32)
        sum_ref[...] = jnp.sum(x, axis=-1, keepdims=True)
        max_ref[...] = jnp.max(x, axis=-1, keepdims=True)


def _pool_tiled_kernel(x_ref, sum_ref, max_ref, sum_sc, max_sc, *,
                       spatial_size, col_block, n_col_per_split, any_ragged):
    """Large spatial extent: accumulate lane-wide partials across column tiles.

    Grid: (split [parallel], row_block [parallel], col_tile [arbitrary]).
    Outputs are per-split partial (sum, max); the wrapper combines splits.
    """
    s = pl.program_id(0)
    k = pl.program_id(2)
    rows = sum_sc.shape[0]
    n_chunks = col_block // _LANES
    first = k == 0

    def accumulate(masked):
        if masked:
            tile_base = (s * n_col_per_split + k) * col_block
            lane = lax.broadcasted_iota(jnp.int32, (rows, _LANES), 1)

        def body(j, carry):
            ps, pm = carry
            off = pl.multiple_of(j * _LANES, _LANES)
            xj = x_ref[:, pl.ds(off, _LANES)].astype(jnp.float32)
            if masked:
                inb = (tile_base + off + lane) < spatial_size
                ps = ps + jnp.where(inb, xj, 0.0)
                pm = jnp.maximum(pm, jnp.where(inb, xj, -jnp.inf))
            else:
                ps = ps + xj
                pm = jnp.maximum(pm, xj)
            return ps, pm

        ps, pm = lax.fori_loop(
            0, n_chunks, body,
            (jnp.zeros((rows, _LANES), jnp.float32),
             jnp.full((rows, _LANES), -jnp.inf, jnp.float32)),
            unroll=min(8, n_chunks))

        # Write-through on the first spatial step of this (split, row-block);
        # read-modify-write only afterwards.
        @pl.when(first)
        def _():
            sum_sc[...] = ps
            max_sc[...] = pm

        @pl.when(jnp.logical_not(first))
        def _():
            sum_sc[...] = sum_sc[...] + ps
            max_sc[...] = jnp.maximum(max_sc[...], pm)

    if any_ragged:
        # Only tiles that actually reach past S pay for the masked path.
        tile_end = (s * n_col_per_split + k + 1) * col_block
        is_ragged = tile_end > spatial_size

        @pl.when(is_ragged)
        def _():
            accumulate(True)

        @pl.when(jnp.logical_not(is_ragged))
        def _():
            accumulate(False)
    else:
        accumulate(False)

    # Single cross-lane (XLU) reduce per (split, row-block), at the last tile.
    @pl.when(k == pl.num_programs(2) - 1)
    def _():
        sum_ref[0] = jnp.sum(sum_sc[...], axis=-1, keepdims=True)
        max_ref[0] = jnp.max(max_sc[...], axis=-1, keepdims=True)


# ---------------------------------------------------------------------------
# Wrapper
# ---------------------------------------------------------------------------

def _global_avg_max(x2d):
    """x2d: (R, S) -> (avg, max), each (R, 1) float32, via Pallas kernels."""
    R, S = x2d.shape
    itemsize = jnp.dtype(x2d.dtype).itemsize
    sub = _SUBLANE.get(itemsize, 8)
    inv_s = jnp.float32(1.0 / S)

    cost = pl.CostEstimate(flops=2 * R * S, transcendentals=0,
                           bytes_accessed=R * S * itemsize + 2 * R * 4)

    single_pass = S * itemsize * sub <= _SINGLE_PASS_BYTES

    if single_pass:
        rows_budget = max(sub, _SINGLE_PASS_BYTES // (S * itemsize))
        row_block = max(sub, min(512, (rows_budget // sub) * sub))
        if R <= row_block:
            row_block = R
        n_row = pl.cdiv(R, row_block)

        grid_spec = pltpu.PrefetchScalarGridSpec(
            num_scalar_prefetch=0,
            grid=(n_row,),
            in_specs=[pl.BlockSpec((row_block, S), lambda i: (i, 0))],
            out_specs=[pl.BlockSpec((row_block, 1), lambda i: (i, 0)),
                       pl.BlockSpec((row_block, 1), lambda i: (i, 0))],
            scratch_shapes=[],
        )
        sums, maxes = pl.pallas_call(
            _pool_single_kernel,
            out_shape=(jax.ShapeDtypeStruct((R, 1), jnp.float32),
                       jax.ShapeDtypeStruct((R, 1), jnp.float32)),
            grid_spec=grid_spec,
            compiler_params=pltpu.CompilerParams(
                dimension_semantics=("parallel",),
                vmem_limit_bytes=32 * 1024 * 1024),
            cost_estimate=cost,
        )(x2d)
        return sums * inv_s, maxes

    # ---- tiled path (S > 65536) ----
    row_block = _ROW_BLOCK_TILED if R >= _ROW_BLOCK_TILED else R
    col_block = (_tiled_block_bytes() // (row_block * itemsize)) // _LANES * _LANES
    col_block = max(8 * _LANES, min(col_block, _COL_BLOCK_MAX))

    n_row = pl.cdiv(R, row_block)
    n_col = pl.cdiv(S, col_block)
    # Spatial split: when a single row block would leave one TensorCore idle
    # on megacore parts (v7x), split the spatial axis into a leading parallel
    # axis; near-zero cost on single-core parts (same total tiles).
    n_split = 2 if (n_row == 1 and n_col >= 4) else 1
    per_split = pl.cdiv(n_col, n_split)
    any_ragged = (n_split * per_split * col_block) > S

    kernel = functools.partial(
        _pool_tiled_kernel, spatial_size=S, col_block=col_block,
        n_col_per_split=per_split, any_ragged=any_ragged)

    def x_map(s, i, k, _per=per_split, _ncol=n_col):
        # Clamp so the (rare) fully-out-of-range tile of the last split reads
        # a valid block; the kernel masks it out entirely.
        return (i, jnp.minimum(s * _per + k, _ncol - 1))

    grid_spec = pltpu.PrefetchScalarGridSpec(
        num_scalar_prefetch=0,
        grid=(n_split, n_row, per_split),
        in_specs=[pl.BlockSpec((row_block, col_block), x_map)],
        # TODO(synk): sweep pipeline_mode=pl.Buffered(3) on the input spec for
        # v7x once the 2-buffer baseline is profiled.
        out_specs=[pl.BlockSpec((1, row_block, 1), lambda s, i, k: (s, i, 0)),
                   pl.BlockSpec((1, row_block, 1), lambda s, i, k: (s, i, 0))],
        scratch_shapes=[pltpu.VMEM((row_block, _LANES), jnp.float32),
                        pltpu.VMEM((row_block, _LANES), jnp.float32)],
    )
    sums, maxes = pl.pallas_call(
        kernel,
        out_shape=(jax.ShapeDtypeStruct((n_split, R, 1), jnp.float32),
                   jax.ShapeDtypeStruct((n_split, R, 1), jnp.float32)),
        grid_spec=grid_spec,
        compiler_params=pltpu.CompilerParams(
            dimension_semantics=("parallel", "parallel", "arbitrary"),
            vmem_limit_bytes=32 * 1024 * 1024),
        cost_estimate=cost,
    )(x2d)

    sums = jnp.sum(sums, axis=0)     # (R, 1)
    maxes = jnp.max(maxes, axis=0)   # (R, 1)
    return sums * inv_s, maxes


# ---------------------------------------------------------------------------
# Module
# ---------------------------------------------------------------------------

class SelectAdaptivePool3d:
    """JAX/Pallas port of SelectAdaptivePool3d (global pooling, output_size=1)."""

    def __init__(self, output_size=1, pool_type="fast", flatten=False):
        self.pool_type = pool_type or ""
        self.output_size = output_size
        self.flatten = flatten
        if self.pool_type == "fast":
            assert output_size == 1
        # TODO(synk): output_size > 1 adaptive (windowed) pooling is not
        # implemented; only the global output_size=1 hot path uses the kernel.
        assert self.pool_type == "" or output_size == 1, \
            "only output_size=1 is supported"

    def is_identity(self):
        return not self.pool_type

    def __call__(self, x):
        if self.pool_type == "":
            # nn.Identity pool; nn.Flatten(1) still applies when requested.
            return x.reshape(x.shape[0], -1) if self.flatten else x

        N, C, D, H, W = x.shape
        S = D * H * W
        avg, mx = _global_avg_max(x.reshape(N * C, S))   # (N*C, 1) f32 each

        if self.pool_type == "fast":
            pooled = avg.astype(x.dtype).reshape(N, C)
            return pooled if self.flatten else pooled.reshape(N, C, 1, 1, 1)

        if self.pool_type == "avg":
            out = avg.astype(x.dtype).reshape(N, C, 1, 1, 1)
        elif self.pool_type == "max":
            out = mx.astype(x.dtype).reshape(N, C, 1, 1, 1)
        elif self.pool_type == "avgmax":
            out = (0.5 * (avg + mx)).astype(x.dtype).reshape(N, C, 1, 1, 1)
        elif self.pool_type == "catavgmax":
            out = jnp.concatenate(
                [avg.astype(x.dtype).reshape(N, C, 1, 1, 1),
                 mx.astype(x.dtype).reshape(N, C, 1, 1, 1)], axis=1)
        else:
            raise AssertionError("Invalid pool type: %s" % self.pool_type)

        if self.flatten:
            out = out.reshape(out.shape[0], -1)
        return out


# ---------------------------------------------------------------------------
# Self-test
# ---------------------------------------------------------------------------

if __name__ == "__main__":
    key = jax.random.PRNGKey(0)
    k1, k2, k3, k4, k5 = jax.random.split(key, 5)

    def ref_avg_max(a):
        af = a.astype(jnp.float32)
        return (jnp.mean(af, axis=(2, 3, 4), keepdims=True),
                jnp.max(af, axis=(2, 3, 4), keepdims=True))

    # 1) Small NCDHW input: single-pass, chunked reduce (S=512 % 128 == 0).
    x = jax.random.normal(k1, (2, 4, 8, 8, 8), dtype=jnp.float32)
    ra, rm = ref_avg_max(x)

    out = jax.block_until_ready(SelectAdaptivePool3d(1, "fast", False)(x))
    assert out.shape == (2, 4, 1, 1, 1)
    assert jnp.allclose(out, ra, atol=1e-5, rtol=1e-5)

    checks = {
        "avg": ra, "max": rm, "avgmax": 0.5 * (ra + rm),
        "catavgmax": jnp.concatenate([ra, rm], axis=1),
    }
    for pt, ref in checks.items():
        o = jax.block_until_ready(SelectAdaptivePool3d(1, pt, False)(x))
        assert o.shape == ref.shape, (pt, o.shape)
        assert jnp.allclose(o, ref, atol=1e-5, rtol=1e-5), pt
        of = jax.block_until_ready(SelectAdaptivePool3d(1, pt, True)(x))
        assert of.shape == (ref.shape[0], ref.shape[1]), (pt, of.shape)
        assert jnp.allclose(of, ref.reshape(ref.shape[0], -1),
                            atol=1e-5, rtol=1e-5), pt

    o = jax.block_until_ready(SelectAdaptivePool3d(1, "fast", True)(x))
    assert o.shape == (2, 4)
    o = jax.block_until_ready(SelectAdaptivePool3d(1, "", True)(x))
    assert o.shape == (2, 4 * 8 * 8 * 8)

    # 2) Ragged spatial size (S=315), single-pass plain-reduce path.
    x2 = jax.random.normal(k2, (2, 3, 5, 7, 9), dtype=jnp.float32)
    ra2, rm2 = ref_avg_max(x2)
    o = jax.block_until_ready(SelectAdaptivePool3d(1, "avgmax", False)(x2))
    assert jnp.allclose(o, 0.5 * (ra2 + rm2), atol=1e-5, rtol=1e-5)

    # 3) Tiled path, ragged columns, no spatial split (R=2, S=75264).
    x3 = jax.random.normal(k3, (1, 2, 24, 56, 56), dtype=jnp.float32)
    ra3, rm3 = ref_avg_max(x3)
    o = jax.block_until_ready(SelectAdaptivePool3d(1, "avgmax", False)(x3))
    assert jnp.allclose(o, 0.5 * (ra3 + rm3), atol=1e-4, rtol=1e-4)

    # 3b) Same shape in bf16: native-dtype DMA, f32 accumulation, tiled+masked.
    x3b = x3.astype(jnp.bfloat16)
    ra3b, rm3b = ref_avg_max(x3b)
    ob = jax.block_until_ready(SelectAdaptivePool3d(1, "avgmax", False)(x3b))
    assert ob.dtype == jnp.bfloat16
    assert jnp.allclose(ob.astype(jnp.float32), 0.5 * (ra3b + rm3b),
                        atol=5e-2, rtol=5e-2)

    # 4) Tiled path with spatial split (single row block, n_col >= 4):
    #    R=8, S=204800 -> grid (2, 1, 2), ragged last tile.
    x4 = jax.random.normal(k4, (1, 8, 50, 64, 64), dtype=jnp.float32)
    ra4, rm4 = ref_avg_max(x4)
    o = jax.block_until_ready(SelectAdaptivePool3d(1, "avgmax", False)(x4))
    assert jnp.allclose(o, 0.5 * (ra4 + rm4), atol=1e-4, rtol=1e-4)

    # 5) Tiled path, multiple (ragged) row blocks, non-ragged columns:
    #    R=96, S=73728 = 9 * 8192 exactly.
    x5 = jax.random.normal(k5, (1, 96, 18, 64, 64), dtype=jnp.float32)
    ra5, rm5 = ref_avg_max(x5)
    o = jax.block_until_ready(SelectAdaptivePool3d(1, "catavgmax", False)(x5))
    assert o.shape == (1, 192, 1, 1, 1)
    assert jnp.allclose(o, jnp.concatenate([ra5, rm5], axis=1),
                        atol=1e-4, rtol=1e-4)

    # 6) bf16 small input through the 'fast' path.
    xb = x.astype(jnp.bfloat16)
    rab, _ = ref_avg_max(xb)
    ob = jax.block_until_ready(SelectAdaptivePool3d(1, "fast", False)(xb))
    assert ob.dtype == jnp.bfloat16
    assert jnp.allclose(ob.astype(jnp.float32), rab, atol=2e-2, rtol=2e-2)

    print("KERNEL_OK")
</pallas_src>

<mosaic_0001>
module attributes {stable_mosaic.version = 11 : i64} {
  func.func @_pool_single_kernel(%arg0: i32, %arg1: memref<8x512xf32, #tpu.memory_space<vmem>>, %arg2: memref<8x1xf32, #tpu.memory_space<vmem>>, %arg3: memref<8x1xf32, #tpu.memory_space<vmem>>) attributes {dimension_semantics = [#tpu.dimension_semantics<parallel>], iteration_bounds = array<i64: 1>, scalar_prefetch = 0 : i64, scratch_operands = 0 : i64, tpu.core_type = #tpu.core_type<tc>, window_params = [{transform_indices = @transform_0, window_bounds = array<i64: 8, 512>}, {transform_indices = @transform_1, window_bounds = array<i64: 8, 1>}, {transform_indices = @transform_2, window_bounds = array<i64: 8, 1>}]} {
    %cst = arith.constant 0.000000e+00 : f32
    %0 = vector.broadcast %cst : f32 to vector<8x128xf32>
    %cst_0 = arith.constant 0xFF800000 : f32
    %1 = vector.broadcast %cst_0 : f32 to vector<8x128xf32>
    %c0_i32 = arith.constant 0 : i32
    %c128_i32 = arith.constant 128 : i32
    %2 = arith.muli %c0_i32, %c128_i32 : i32
    %3 = tpu.assume_multiple %2, 128 : i32
    %c0 = arith.constant 0 : index
    %4 = arith.index_cast %3 : i32 to index
    %5 = vector.load %arg1[%c0, %4] : memref<8x512xf32, #tpu.memory_space<vmem>>, vector<8x128xf32>
    %6 = arith.addf %0, %5 : vector<8x128xf32>
    %7 = arith.maximumf %1, %5 : vector<8x128xf32>
    %c1_i32 = arith.constant 1 : i32
    %c128_i32_1 = arith.constant 128 : i32
    %8 = arith.muli %c1_i32, %c128_i32_1 : i32
    %9 = tpu.assume_multiple %8, 128 : i32
    %c0_2 = arith.constant 0 : index
    %10 = arith.index_cast %9 : i32 to index
    %11 = vector.load %arg1[%c0_2, %10] : memref<8x512xf32, #tpu.memory_space<vmem>>, vector<8x128xf32>
    %12 = arith.addf %6, %11 : vector<8x128xf32>
    %13 = arith.maximumf %7, %11 : vector<8x128xf32>
    %c2_i32 = arith.constant 2 : i32
    %c128_i32_3 = arith.constant 128 : i32
    %14 = arith.muli %c2_i32, %c128_i32_3 : i32
    %15 = tpu.assume_multiple %14, 128 : i32
    %c0_4 = arith.constant 0 : index
    %16 = arith.index_cast %15 : i32 to index
    %17 = vector.load %arg1[%c0_4, %16] : memref<8x512xf32, #tpu.memory_space<vmem>>, vector<8x128xf32>
    %18 = arith.addf %12, %17 : vector<8x128xf32>
    %19 = arith.maximumf %13, %17 : vector<8x128xf32>
    %c3_i32 = arith.constant 3 : i32
    %c128_i32_5 = arith.constant 128 : i32
    %20 = arith.muli %c3_i32, %c128_i32_5 : i32
    %21 = tpu.assume_multiple %20, 128 : i32
    %c0_6 = arith.constant 0 : index
    %22 = arith.index_cast %21 : i32 to index
    %23 = vector.load %arg1[%c0_6, %22] : memref<8x512xf32, #tpu.memory_space<vmem>>, vector<8x128xf32>
    %24 = arith.addf %18, %23 : vector<8x128xf32>
    %25 = arith.maximumf %19, %23 : vector<8x128xf32>
    %c4_i32 = arith.constant 4 : i32
    %cst_7 = arith.constant dense<0.000000e+00> : vector<8xf32>
    %26 = vector.multi_reduction <add>, %24, %cst_7 [1] : vector<8x128xf32> to vector<8xf32>
    %27 = vector.shape_cast %26 : vector<8xf32> to vector<8x1xf32>
    %c0_8 = arith.constant 0 : index
    %c0_9 = arith.constant 0 : index
    %28 = vector.load %arg2[%c0_8, %c0_9] : memref<8x1xf32, #tpu.memory_space<vmem>>, vector<8x1xf32>
    tpu.vector_store %arg2[%c0_8, %c0_9], %27 {strides = array<i32>} : memref<8x1xf32, #tpu.memory_space<vmem>>, vector<8x1xf32>,
    %cst_10 = arith.constant dense<0xFF800000> : vector<8xf32>
    %29 = vector.multi_reduction <maximumf>, %25, %cst_10 [1] : vector<8x128xf32> to vector<8xf32>
    %30 = vector.shape_cast %29 : vector<8xf32> to vector<8x1xf32>
    %c0_11 = arith.constant 0 : index
    %c0_12 = arith.constant 0 : index
    %31 = vector.load %arg3[%c0_11, %c0_12] : memref<8x1xf32, #tpu.memory_space<vmem>>, vector<8x1xf32>
    tpu.vector_store %arg3[%c0_11, %c0_12], %30 {strides = array<i32>} : memref<8x1xf32, #tpu.memory_space<vmem>>, vector<8x1xf32>,
    return
  }
  func.func @transform_0(%arg0: i32) -> (i32, i32) {
    %c0_i32 = arith.constant 0 : i32
    %c0_i32_0 = arith.constant 0 : i32
    return %arg0, %c0_i32 : i32, i32
  }
  func.func @transform_1(%arg0: i32) -> (i32, i32) {
    %c0_i32 = arith.constant 0 : i32
    %c0_i32_0 = arith.constant 0 : i32
    return %arg0, %c0_i32 : i32, i32
  }
  func.func @transform_2(%arg0: i32) -> (i32, i32) {
    %c0_i32 = arith.constant 0 : i32
    %c0_i32_0 = arith.constant 0 : i32
    return %arg0, %c0_i32 : i32, i32
  }
}

</mosaic_0001>

<bundles_post_ra>
// kernel: tpu_custom_call.1
= control target key start
LH: loop header
LB: loop body
LE: loop exit
PB: predicated region body
PF: predicated region fallthrough
CT: control target
= control target key end

     0   :  { %8 = vsyncpa [#allocation3], 0  ;;  %s81_s12 = smov [#allocation2]   ;;  %s106_s0 = inlined_call_operand.hbm [shape: f32[8,512], index: 0, kind: input, shape index: {}]   ;;  %s107_s1 = inlined_call_operand.vmem [shape: f32[8,1], index: 1, kind: output, shape index: {0}]   ;;  %s108_s2 = inlined_call_operand.vmem [shape: f32[8,1], index: 2, kind: output, shape index: {1}]  }
   0x1   :  { %s14_s11 = sshll.u32 %s106_s0, 4  ;;  %s16_s13 = sshll.u32 %s81_s12, 4  ;;  %s15_s11 = int_to_ptr.hbm [resolvable:$true] %s14_s11  ;;  %s17_s13 = int_to_ptr.vmem [resolvable:$true] %s16_s13 }
   0x2   :  { %19 = dma.hbm_to_vmem [thread:$0]  %s15_s11, 512, %s17_s13, [#allocation3]  }
   0x3   :  { %79 = dma.done.wait [#allocation3], 512  }
   0x4   :  { %80 = vsyncadd [#allocation3], 4294966784  ;;  %v24_v0 = vld [vmem:[#allocation2] sm:$0xff]  ;;  %v27_v1 = vld [vmem:[#allocation2 + $0x8] sm:$0xff]  ;;  %vm40_vm0 = vcmask 7168  }
   0x5   :  { %v31_v2 = vld [vmem:[#allocation2 + $0x10] sm:$0xff]  ;;  %v28_v3 = vadd.f32 %v27_v1, %v24_v0  ;;  %v35_v4 = vld [vmem:[#allocation2 + $0x18] sm:$0xff]  ;;  %v29_v6 = vmax.f32 %v24_v0, %v27_v1 }
   0x7   :  { %v32_v5 = vadd.f32 %v31_v2, %v28_v3  ;;  %v33_v8 = vmax.f32 %v29_v6, %v31_v2 }
   0x9   :  { %v36_v7 = vadd.f32 %v35_v4, %v32_v5  ;;  %v37_v9 = vmax.f32 %v33_v8, %v35_v4 }
   0xb   :  { %38 = vadd.xlane.f32.xlu0 %v36_v7 }
  0x13   :  { %42 = vmax.xlane.f32.xlu0 %v37_v9 }
  0x7e   :  { %v39_v10 = vpop.xlane.xlu0 %38 }
  0x7f   :  { %41 = vst.msk [vmem:[%s107_s1] sm:$0xff] %vm40_vm0, %v39_v10 }
  0x86   :  { %v43_v11 = vpop.xlane.xlu0 %42 }
  0x87   :  { %44 = vst.msk [vmem:[%s108_s2] sm:$0xff] %vm40_vm0, %v43_v11 }
  0x88   :  { %53 = vsyncpa [#allocation3], 1 }

</bundles_post_ra>
